<compile_context>
chip_gen: v6e
topology: v6e:2x2x1
jax: 0.10.0
libtpu: 0.0.40
codegen_flags: <defaults>
</compile_context>

<pallas_src>
import functools

import jax
import jax.numpy as jnp
import numpy as np
from jax.experimental import pallas as pl
from jax.experimental.pallas import tpu as pltpu

# ----------------------------- configuration -------------------------------
MP_HIDDEN = 128          # MP_hidden (default)
MP_DEPTH = 3             # MP_depth  (default)
ATOM_FDIM = 16           # stand-in for chemprop's get_atom_fdim()
BOND_FDIM = 8            # stand-in for get_bond_fdim(atom_messages=True)
MAX_NB = 4               # max neighbours per atom
NUM_MOLS = 8
ATOMS_PER_MOL_PAD = 8    # each molecule padded to 8 contiguous atom rows
BONDS_PER_MOL_PAD = 8    # each molecule padded to 8 contiguous bond rows
MOLS_PER_TILE = 4        # molecules processed per grid step
N_ATOMS = NUM_MOLS * ATOMS_PER_MOL_PAD   # 64
N_BONDS = NUM_MOLS * BONDS_PER_MOL_PAD   # 64


# ------------------------------- kernel ------------------------------------
def _mpnn_tile_kernel(
    # inputs (per-tile blocks first, then VMEM-resident weights)
    f_atoms_ref, f_bonds_ref, a_atom_ref, a_bond_ref, valid_ref,
    w_fused_ref, b_fused_ref, wh_a_ref, wh_b_ref, bh_ref, wo_h_ref,
    # output
    mol_vecs_ref,
    *, mp_depth, mols_per_tile, atoms_per_mol, hidden,
):
    f_atoms = f_atoms_ref[...]                                   # [TM, Fa]
    # Diagonal neighbour-count block for this tile; bf16 storage (counts are
    # exact), upcast once so MXU accumulation stays f32.
    a_atom = a_atom_ref[0].astype(jnp.float32)                   # [TM, TM]
    wh_a = wh_a_ref[...]                                         # [H, H]
    bh = bh_ref[...]                                             # [1, H]

    # Fused K=16 matmul: one [TM,Fa]@[Fa,2H] push gives both W_i(f_atoms)+b_i
    # and the f_atoms part of W_o (+ b_o), split at lane 128.
    fa_proj = jnp.dot(f_atoms, w_fused_ref[...],
                      preferred_element_type=jnp.float32) + b_fused_ref[...]
    x = fa_proj[:, :hidden]                                      # W_i path
    wo_atom_term = fa_proj[:, hidden:]                           # W_o atom part
    message = jnp.maximum(x, 0.0)                                # [TM, H]

    # Loop-invariant bond term, hoisted out of the depth loop:
    #   (sum_j f_bonds[a2b[i,j]]) @ W_h_bond + b_h
    nei_bond_sum = jnp.dot(a_bond_ref[0].astype(jnp.float32), f_bonds_ref[...],
                           preferred_element_type=jnp.float32)   # [TM, Fb]
    bond_term = jnp.dot(nei_bond_sum, wh_b_ref[...],
                        preferred_element_type=jnp.float32) + bh  # [TM, H]

    for _ in range(mp_depth - 1):
        # sum_j message[a2a[i,j]] expressed as a count-block matmul (MXU)
        nei_atom_sum = jnp.dot(a_atom, message, preferred_element_type=jnp.float32)
        m = jnp.dot(nei_atom_sum, wh_a, preferred_element_type=jnp.float32) + bond_term
        message = jnp.maximum(x + m, 0.0)
        # dropout: eval-mode identity

    # final aggregation + W_o(cat(f_atoms, a_message)) + ReLU
    a_message = jnp.dot(a_atom, message, preferred_element_type=jnp.float32)
    atom_hiddens = jnp.maximum(
        wo_atom_term
        + jnp.dot(a_message, wo_h_ref[...], preferred_element_type=jnp.float32),
        0.0,
    )                                                            # [TM, H]
    # dropout: eval-mode identity

    # readout = 'max' per molecule as one segmented max. Masking pad rows to 0
    # is exact ONLY because atom_hiddens >= 0 after ReLU and every molecule has
    # >= 1 valid atom (asserted in the wrapper); other readouts would need a
    # different pad value.
    atom_hiddens = atom_hiddens * valid_ref[...]                 # [TM, 1] broadcast
    mol_vecs_ref[0] = jnp.max(
        atom_hiddens.reshape(mols_per_tile, atoms_per_mol, hidden), axis=1)


# --------------------------- wrapper helpers --------------------------------
def _build_block_counts(idx, rows_per_tile, cols_per_tile):
    """Per-tile diagonal blocks of the neighbour-count matrix (host-side, O(N*TM))."""
    idx = np.asarray(idx)
    n_rows, max_nb = idx.shape
    num_tiles = n_rows // rows_per_tile
    row = np.arange(n_rows)
    tile = row // rows_per_tile
    local_row = row % rows_per_tile
    blocks = np.zeros((num_tiles, rows_per_tile, cols_per_tile), np.float32)
    for j in range(max_nb):
        local_col = idx[:, j] - tile * cols_per_tile
        assert ((local_col >= 0) & (local_col < cols_per_tile)).all(), \
            "neighbour crosses tile boundary (block-diagonal assumption violated)"
        np.add.at(blocks, (tile, local_row, local_col), 1.0)
    return blocks


# ------------------------------- wrapper ------------------------------------
def mpnn_forward(f_atoms, f_bonds, a2a, a2b, a_scope, params,
                 *, atoms_per_mol_pad=ATOMS_PER_MOL_PAD,
                 bonds_per_mol_pad=BONDS_PER_MOL_PAD,
                 mols_per_tile=MOLS_PER_TILE):
    """Full MPNN forward pass; hot path in one tiled Pallas TPU kernel."""
    n_atoms, atom_fdim = f_atoms.shape
    n_bonds, bond_fdim = f_bonds.shape
    num_mols = len(a_scope)
    assert num_mols % mols_per_tile == 0
    num_tiles = num_mols // mols_per_tile
    tm = mols_per_tile * atoms_per_mol_pad          # atoms per tile (sublane-aligned)
    tb = mols_per_tile * bonds_per_mol_pad          # bonds per tile
    assert tm % 8 == 0
    assert n_atoms == num_mols * atoms_per_mol_pad
    assert n_bonds == num_mols * bonds_per_mol_pad
    for m, (start, size) in enumerate(a_scope):
        # >=1 valid atom per molecule keeps the masked-to-zero max readout exact.
        assert start == m * atoms_per_mol_pad and 1 <= size <= atoms_per_mol_pad

    # Block-diagonal neighbour-count blocks, bf16 (exact for small integer counts).
    a_atom_blocks = jnp.asarray(_build_block_counts(a2a, tm, tm), jnp.bfloat16)
    a_bond_blocks = jnp.asarray(_build_block_counts(a2b, tm, tb), jnp.bfloat16)

    # Per-row validity mask (1.0 for real atoms, 0.0 for per-molecule pad rows).
    valid = np.zeros((n_atoms, 1), np.float32)
    for m, (start, size) in enumerate(a_scope):
        valid[start:start + size, 0] = 1.0
    valid = jnp.asarray(valid)

    wi, bi, wh, bh, wo, bo, wf, bf = params
    hidden = wi.shape[1]
    # Split concat-style linears into separate operands (no in-kernel concat).
    wh_a, wh_b = wh[:hidden], wh[hidden:]
    wo_a, wo_h = wo[:atom_fdim], wo[atom_fdim:]
    # Fuse the two tiny K=Fa matmuls on f_atoms into one [Fa, 2H] weight.
    w_fused = jnp.concatenate([wi, wo_a], axis=1)                 # [Fa, 2H]
    b_fused = jnp.concatenate([bi, bo]).reshape(1, 2 * hidden)    # [1, 2H]

    kernel = functools.partial(
        _mpnn_tile_kernel, mp_depth=MP_DEPTH, mols_per_tile=mols_per_tile,
        atoms_per_mol=atoms_per_mol_pad, hidden=hidden)

    const2 = lambda i: (0, 0)       # weights/biases: VMEM-resident across the grid
    in_specs = [
        pl.BlockSpec((tm, atom_fdim), lambda i: (i, 0)),          # f_atoms tile
        pl.BlockSpec((tb, bond_fdim), lambda i: (i, 0)),          # f_bonds tile
        pl.BlockSpec((1, tm, tm), lambda i: (i, 0, 0)),           # A_atom diag block
        pl.BlockSpec((1, tm, tb), lambda i: (i, 0, 0)),           # A_bond diag block
        pl.BlockSpec((tm, 1), lambda i: (i, 0)),                  # valid mask
        pl.BlockSpec((atom_fdim, 2 * hidden), const2),            # w_fused
        pl.BlockSpec((1, 2 * hidden), const2),                    # b_fused
        pl.BlockSpec((hidden, hidden), const2),                   # wh_a
        pl.BlockSpec((bond_fdim, hidden), const2),                # wh_b
        pl.BlockSpec((1, hidden), const2),                        # bh
        pl.BlockSpec((hidden, hidden), const2),                   # wo_h
    ]
    out_specs = pl.BlockSpec((1, mols_per_tile, hidden), lambda i: (i, 0, 0))

    inputs = (f_atoms, f_bonds, a_atom_blocks, a_bond_blocks, valid,
              w_fused, b_fused, wh_a, wh_b, bh.reshape(1, -1), wo_h)

    # Advisory cost estimate so XLA schedules surrounding ops around the call.
    flops_per_tile = (
        2 * tm * atom_fdim * 2 * hidden                   # fused f_atoms projection
        + 2 * tm * tb * bond_fdim                         # A_bond @ f_bonds
        + 2 * tm * bond_fdim * hidden                     # bond term @ W_h_b
        + (MP_DEPTH - 1) * (2 * tm * tm * hidden + 2 * tm * hidden * hidden)
        + 2 * tm * tm * hidden                            # final aggregation
        + 2 * tm * hidden * hidden)                       # a_message @ W_o_h
    bytes_accessed = sum(int(np.prod(a.shape)) * a.dtype.itemsize for a in inputs)
    bytes_accessed += num_tiles * mols_per_tile * hidden * 4

    mol_vecs = pl.pallas_call(
        kernel,
        out_shape=jax.ShapeDtypeStruct((num_tiles, mols_per_tile, hidden), jnp.float32),
        grid=(num_tiles,),
        in_specs=in_specs,
        out_specs=out_specs,
        compiler_params=pltpu.CompilerParams(
            dimension_semantics=("parallel",),            # shards tiles across TCs (v7x)
            vmem_limit_bytes=32 * 1024 * 1024),
        cost_estimate=pl.CostEstimate(
            flops=num_tiles * flops_per_tile, transcendentals=0,
            bytes_accessed=bytes_accessed),
    )(*inputs)

    mol_vecs = mol_vecs.reshape(num_mols, hidden)
    # FFN head (NN_depth=1): Dropout (eval-mode identity) + Linear(H, 1) in plain
    # JAX so the kernel output stays lane-dense ([*, 128] unmasked stores).
    return mol_vecs @ wf + bf


# -------------------------- pure-JAX reference ------------------------------
def mpnn_reference(f_atoms, f_bonds, a2a, a2b, a_scope, params):
    wi, bi, wh, bh, wo, bo, wf, bf = params
    x = f_atoms @ wi + bi
    message = jnp.maximum(x, 0.0)
    for _ in range(MP_DEPTH - 1):
        nei_a = message[a2a]                              # [Na, nbr, H]
        nei_b = f_bonds[a2b]                              # [Na, nbr, Fb]
        nei = jnp.concatenate([nei_a, nei_b], axis=2).sum(axis=1)
        message = jnp.maximum(x + nei @ wh + bh, 0.0)
    a_msg = message[a2a].sum(axis=1)
    a_in = jnp.concatenate([f_atoms, a_msg], axis=1)
    h = jnp.maximum(a_in @ wo + bo, 0.0)
    mol_vecs = jnp.stack([h[s:s + n].max(axis=0) for (s, n) in a_scope], axis=0)
    return mol_vecs @ wf + bf


# --------------------------------- main --------------------------------------
if __name__ == "__main__":
    key = jax.random.PRNGKey(0)
    ks = jax.random.split(key, 12)

    # Synthetic BatchMolGraph-like components. Atoms and bonds are laid out
    # contiguous per molecule (padded to 8 rows each); every molecule's first
    # bond row is a zero padding bond (kept per-molecule so neighbour indices
    # stay block-diagonal, unlike chemprop's single global pad bond).
    mol_sizes = [8, 6, 7, 5, 8, 6, 8, 7]
    assert len(mol_sizes) == NUM_MOLS
    a_scope = [(m * ATOMS_PER_MOL_PAD, mol_sizes[m]) for m in range(NUM_MOLS)]

    f_atoms = jax.random.normal(ks[0], (N_ATOMS, ATOM_FDIM), jnp.float32)
    f_bonds = jax.random.normal(ks[1], (N_BONDS, BOND_FDIM), jnp.float32)
    pad_bond_rows = jnp.arange(NUM_MOLS, dtype=jnp.int32) * BONDS_PER_MOL_PAD
    f_bonds = f_bonds.at[pad_bond_rows].set(0.0)

    # Neighbour indices: strictly intra-molecule (as in real molecular graphs),
    # which is what makes the per-tile neighbour-count blocks block-diagonal.
    a2a_rows, a2b_rows = [], []
    for m, (start, size) in enumerate(a_scope):
        ka = jax.random.fold_in(ks[2], m)
        kb = jax.random.fold_in(ks[3], m)
        a2a_rows.append(start + jax.random.randint(
            ka, (ATOMS_PER_MOL_PAD, MAX_NB), 0, size, jnp.int32))
        a2b_rows.append(m * BONDS_PER_MOL_PAD + jax.random.randint(
            kb, (ATOMS_PER_MOL_PAD, MAX_NB), 0, BONDS_PER_MOL_PAD, jnp.int32))
    a2a = jnp.concatenate(a2a_rows, axis=0)
    a2b = jnp.concatenate(a2b_rows, axis=0)

    # Deterministic parameters (Linear layers stored as [in, out]).
    scale = 0.1
    wi = scale * jax.random.normal(ks[4], (ATOM_FDIM, MP_HIDDEN), jnp.float32)
    bi = scale * jax.random.normal(ks[5], (MP_HIDDEN,), jnp.float32)
    wh = scale * jax.random.normal(ks[6], (MP_HIDDEN + BOND_FDIM, MP_HIDDEN), jnp.float32)
    bh = scale * jax.random.normal(ks[7], (MP_HIDDEN,), jnp.float32)
    wo = scale * jax.random.normal(ks[8], (ATOM_FDIM + MP_HIDDEN, MP_HIDDEN), jnp.float32)
    bo = scale * jax.random.normal(ks[9], (MP_HIDDEN,), jnp.float32)
    wf = scale * jax.random.normal(ks[10], (MP_HIDDEN, 1), jnp.float32)
    bf = scale * jax.random.normal(ks[11], (1,), jnp.float32)
    params = (wi, bi, wh, bh, wo, bo, wf, bf)

    out = jax.block_until_ready(mpnn_forward(f_atoms, f_bonds, a2a, a2b, a_scope, params))
    ref = jax.block_until_ready(mpnn_reference(f_atoms, f_bonds, a2a, a2b, a_scope, params))

    assert out.shape == (NUM_MOLS, 1)
    np.testing.assert_allclose(np.asarray(out), np.asarray(ref), rtol=1e-4, atol=1e-4)
    print("KERNEL_OK")
</pallas_src>

<mosaic_0001>
module attributes {stable_mosaic.version = 11 : i64} {
  func.func @_mpnn_tile_kernel(%arg0: i32, %arg1: memref<32x16xf32, #tpu.memory_space<vmem>>, %arg2: memref<32x8xf32, #tpu.memory_space<vmem>>, %arg3: memref<1x32x32xbf16, #tpu.memory_space<vmem>>, %arg4: memref<1x32x32xbf16, #tpu.memory_space<vmem>>, %arg5: memref<32x1xf32, #tpu.memory_space<vmem>>, %arg6: memref<16x256xf32, #tpu.memory_space<vmem>>, %arg7: memref<1x256xf32, #tpu.memory_space<vmem>>, %arg8: memref<128x128xf32, #tpu.memory_space<vmem>>, %arg9: memref<8x128xf32, #tpu.memory_space<vmem>>, %arg10: memref<1x128xf32, #tpu.memory_space<vmem>>, %arg11: memref<128x128xf32, #tpu.memory_space<vmem>>, %arg12: memref<1x4x128xf32, #tpu.memory_space<vmem>>) attributes {dimension_semantics = [#tpu.dimension_semantics<parallel>], iteration_bounds = array<i64: 2>, scalar_prefetch = 0 : i64, scratch_operands = 0 : i64, tpu.core_type = #tpu.core_type<tc>, window_params = [{transform_indices = @transform_0, window_bounds = array<i64: 32, 16>}, {transform_indices = @transform_1, window_bounds = array<i64: 32, 8>}, {transform_indices = @transform_2, window_bounds = array<i64: 1, 32, 32>}, {transform_indices = @transform_3, window_bounds = array<i64: 1, 32, 32>}, {transform_indices = @transform_4, window_bounds = array<i64: 32, 1>}, {pipeline_mode = #tpu.pipeline_mode<synchronous>, transform_indices = @transform_5, window_bounds = array<i64: 16, 256>}, {pipeline_mode = #tpu.pipeline_mode<synchronous>, transform_indices = @transform_6, window_bounds = array<i64: 1, 256>}, {pipeline_mode = #tpu.pipeline_mode<synchronous>, transform_indices = @transform_7, window_bounds = array<i64: 128, 128>}, {pipeline_mode = #tpu.pipeline_mode<synchronous>, transform_indices = @transform_8, window_bounds = array<i64: 8, 128>}, {pipeline_mode = #tpu.pipeline_mode<synchronous>, transform_indices = @transform_9, window_bounds = array<i64: 1, 128>}, {pipeline_mode = #tpu.pipeline_mode<synchronous>, transform_indices = @transform_10, window_bounds = array<i64: 128, 128>}, {transform_indices = @transform_11, window_bounds = array<i64: 1, 4, 128>}]} {
    %c0 = arith.constant 0 : index
    %c0_0 = arith.constant 0 : index
    %0 = vector.load %arg1[%c0, %c0_0] : memref<32x16xf32, #tpu.memory_space<vmem>>, vector<32x16xf32>
    %c0_1 = arith.constant 0 : index
    %c0_2 = arith.constant 0 : index
    %c0_3 = arith.constant 0 : index
    %1 = vector.load %arg3[%c0_1, %c0_2, %c0_3] : memref<1x32x32xbf16, #tpu.memory_space<vmem>>, vector<1x32x32xbf16>
    %2 = vector.shape_cast %1 : vector<1x32x32xbf16> to vector<32x32xbf16>
    %3 = arith.extf %2 : vector<32x32xbf16> to vector<32x32xf32>
    %c0_4 = arith.constant 0 : index
    %c0_5 = arith.constant 0 : index
    %4 = vector.load %arg8[%c0_4, %c0_5] : memref<128x128xf32, #tpu.memory_space<vmem>>, vector<128x128xf32>
    %c0_6 = arith.constant 0 : index
    %c0_7 = arith.constant 0 : index
    %5 = vector.load %arg10[%c0_6, %c0_7] : memref<1x128xf32, #tpu.memory_space<vmem>>, vector<1x128xf32>
    %c0_8 = arith.constant 0 : index
    %c0_9 = arith.constant 0 : index
    %6 = vector.load %arg6[%c0_8, %c0_9] : memref<16x256xf32, #tpu.memory_space<vmem>>, vector<16x256xf32>
    %cst = arith.constant dense<0.000000e+00> : vector<32x256xf32>
    %7 = tpu.matmul %0, %6, %cst {dimension_numbers = #tpu.dot_dimension_numbers<[1], [0], [0], [1], [0, 0, 1, 1], [], []>} : vector<32x16xf32>, vector<16x256xf32>, vector<32x256xf32> -> vector<32x256xf32>
    %c0_10 = arith.constant 0 : index
    %c0_11 = arith.constant 0 : index
    %8 = vector.load %arg7[%c0_10, %c0_11] : memref<1x256xf32, #tpu.memory_space<vmem>>, vector<1x256xf32>
    %9 = vector.broadcast %8 : vector<1x256xf32> to vector<32x256xf32>
    %10 = arith.addf %7, %9 : vector<32x256xf32>
    %11 = vector.extract_strided_slice %10 {offsets = [0, 0], sizes = [32, 128], strides = [1, 1]} : vector<32x256xf32> to vector<32x128xf32>
    %12 = vector.extract_strided_slice %10 {offsets = [0, 128], sizes = [32, 128], strides = [1, 1]} : vector<32x256xf32> to vector<32x128xf32>
    %cst_12 = arith.constant 0.000000e+00 : f32
    %13 = vector.broadcast %cst_12 : f32 to vector<32x128xf32>
    %14 = arith.maximumf %11, %13 : vector<32x128xf32>
    %c0_13 = arith.constant 0 : index
    %c0_14 = arith.constant 0 : index
    %c0_15 = arith.constant 0 : index
    %15 = vector.load %arg4[%c0_13, %c0_14, %c0_15] : memref<1x32x32xbf16, #tpu.memory_space<vmem>>, vector<1x32x32xbf16>
    %16 = vector.shape_cast %15 : vector<1x32x32xbf16> to vector<32x32xbf16>
    %17 = arith.extf %16 : vector<32x32xbf16> to vector<32x32xf32>
    %c0_16 = arith.constant 0 : index
    %c0_17 = arith.constant 0 : index
    %18 = vector.load %arg2[%c0_16, %c0_17] : memref<32x8xf32, #tpu.memory_space<vmem>>, vector<32x8xf32>
    %cst_18 = arith.constant dense<0.000000e+00> : vector<32x8xf32>
    %19 = tpu.matmul %17, %18, %cst_18 {dimension_numbers = #tpu.dot_dimension_numbers<[1], [0], [0], [1], [0, 0, 1, 1], [], []>} : vector<32x32xf32>, vector<32x8xf32>, vector<32x8xf32> -> vector<32x8xf32>
    %c0_19 = arith.constant 0 : index
    %c0_20 = arith.constant 0 : index
    %20 = vector.load %arg9[%c0_19, %c0_20] : memref<8x128xf32, #tpu.memory_space<vmem>>, vector<8x128xf32>
    %cst_21 = arith.constant dense<0.000000e+00> : vector<32x128xf32>
    %21 = tpu.matmul %19, %20, %cst_21 {dimension_numbers = #tpu.dot_dimension_numbers<[1], [0], [0], [1], [0, 0, 1, 1], [], []>} : vector<32x8xf32>, vector<8x128xf32>, vector<32x128xf32> -> vector<32x128xf32>
    %22 = vector.broadcast %5 : vector<1x128xf32> to vector<32x128xf32>
    %23 = arith.addf %21, %22 : vector<32x128xf32>
    %cst_22 = arith.constant dense<0.000000e+00> : vector<32x128xf32>
    %24 = tpu.matmul %3, %14, %cst_22 {dimension_numbers = #tpu.dot_dimension_numbers<[1], [0], [0], [1], [0, 0, 1, 1], [], []>} : vector<32x32xf32>, vector<32x128xf32>, vector<32x128xf32> -> vector<32x128xf32>
    %cst_23 = arith.constant dense<0.000000e+00> : vector<32x128xf32>
    %25 = tpu.matmul %24, %4, %cst_23 {dimension_numbers = #tpu.dot_dimension_numbers<[1], [0], [0], [1], [0, 0, 1, 1], [], []>} : vector<32x128xf32>, vector<128x128xf32>, vector<32x128xf32> -> vector<32x128xf32>
    %26 = arith.addf %25, %23 : vector<32x128xf32>
    %27 = arith.addf %11, %26 : vector<32x128xf32>
    %cst_24 = arith.constant 0.000000e+00 : f32
    %28 = vector.broadcast %cst_24 : f32 to vector<32x128xf32>
    %29 = arith.maximumf %27, %28 : vector<32x128xf32>
    %cst_25 = arith.constant dense<0.000000e+00> : vector<32x128xf32>
    %30 = tpu.matmul %3, %29, %cst_25 {dimension_numbers = #tpu.dot_dimension_numbers<[1], [0], [0], [1], [0, 0, 1, 1], [], []>} : vector<32x32xf32>, vector<32x128xf32>, vector<32x128xf32> -> vector<32x128xf32>
    %cst_26 = arith.constant dense<0.000000e+00> : vector<32x128xf32>
    %31 = tpu.matmul %30, %4, %cst_26 {dimension_numbers = #tpu.dot_dimension_numbers<[1], [0], [0], [1], [0, 0, 1, 1], [], []>} : vector<32x128xf32>, vector<128x128xf32>, vector<32x128xf32> -> vector<32x128xf32>
    %32 = arith.addf %31, %23 : vector<32x128xf32>
    %33 = arith.addf %11, %32 : vector<32x128xf32>
    %cst_27 = arith.constant 0.000000e+00 : f32
    %34 = vector.broadcast %cst_27 : f32 to vector<32x128xf32>
    %35 = arith.maximumf %33, %34 : vector<32x128xf32>
    %cst_28 = arith.constant dense<0.000000e+00> : vector<32x128xf32>
    %36 = tpu.matmul %3, %35, %cst_28 {dimension_numbers = #tpu.dot_dimension_numbers<[1], [0], [0], [1], [0, 0, 1, 1], [], []>} : vector<32x32xf32>, vector<32x128xf32>, vector<32x128xf32> -> vector<32x128xf32>
    %c0_29 = arith.constant 0 : index
    %c0_30 = arith.constant 0 : index
    %37 = vector.load %arg11[%c0_29, %c0_30] : memref<128x128xf32, #tpu.memory_space<vmem>>, vector<128x128xf32>
    %cst_31 = arith.constant dense<0.000000e+00> : vector<32x128xf32>
    %38 = tpu.matmul %36, %37, %cst_31 {dimension_numbers = #tpu.dot_dimension_numbers<[1], [0], [0], [1], [0, 0, 1, 1], [], []>} : vector<32x128xf32>, vector<128x128xf32>, vector<32x128xf32> -> vector<32x128xf32>
    %39 = arith.addf %12, %38 : vector<32x128xf32>
    %cst_32 = arith.constant 0.000000e+00 : f32
    %40 = vector.broadcast %cst_32 : f32 to vector<32x128xf32>
    %41 = arith.maximumf %39, %40 : vector<32x128xf32>
    %c0_33 = arith.constant 0 : index
    %c0_34 = arith.constant 0 : index
    %42 = vector.load %arg5[%c0_33, %c0_34] : memref<32x1xf32, #tpu.memory_space<vmem>>, vector<32x1xf32>
    %43 = vector.broadcast %42 : vector<32x1xf32> to vector<32x128xf32>
    %44 = arith.mulf %41, %43 : vector<32x128xf32>
    %45 = vector.shape_cast %44 : vector<32x128xf32> to vector<4x8x128xf32>
    %cst_35 = arith.constant dense<0xFF800000> : vector<4x128xf32>
    %46 = vector.multi_reduction <maximumf>, %45, %cst_35 [1] : vector<4x8x128xf32> to vector<4x128xf32>
    %c0_36 = arith.constant 0 : index
    %c0_37 = arith.constant 0 : index
    %c0_38 = arith.constant 0 : index
    %47 = vector.load %arg12[%c0_36, %c0_37, %c0_38] : memref<1x4x128xf32, #tpu.memory_space<vmem>>, vector<1x4x128xf32>
    %48 = vector.shape_cast %47 : vector<1x4x128xf32> to vector<4x128xf32>
    %49 = vector.shape_cast %46 : vector<4x128xf32> to vector<1x4x128xf32>
    tpu.vector_store %arg12[%c0_36, %c0_37, %c0_38], %49 {strides = array<i32>} : memref<1x4x128xf32, #tpu.memory_space<vmem>>, vector<1x4x128xf32>,
    return
  }
  func.func @transform_0(%arg0: i32) -> (i32, i32) {
    %c0_i32 = arith.constant 0 : i32
    %c0_i32_0 = arith.constant 0 : i32
    return %arg0, %c0_i32 : i32, i32
  }
  func.func @transform_1(%arg0: i32) -> (i32, i32) {
    %c0_i32 = arith.constant 0 : i32
    %c0_i32_0 = arith.constant 0 : i32
    return %arg0, %c0_i32 : i32, i32
  }
  func.func @transform_2(%arg0: i32) -> (i32, i32, i32) {
    %c0_i32 = arith.constant 0 : i32
    %c0_i32_0 = arith.constant 0 : i32
    %c0_i32_1 = arith.constant 0 : i32
    return %arg0, %c0_i32, %c0_i32_0 : i32, i32, i32
  }
  func.func @transform_3(%arg0: i32) -> (i32, i32, i32) {
    %c0_i32 = arith.constant 0 : i32
    %c0_i32_0 = arith.constant 0 : i32
    %c0_i32_1 = arith.constant 0 : i32
    return %arg0, %c0_i32, %c0_i32_0 : i32, i32, i32
  }
  func.func @transform_4(%arg0: i32) -> (i32, i32) {
    %c0_i32 = arith.constant 0 : i32
    %c0_i32_0 = arith.constant 0 : i32
    return %arg0, %c0_i32 : i32, i32
  }
  func.func @transform_5(%arg0: i32) -> (i32, i32) {
    %c0_i32 = arith.constant 0 : i32
    %c0_i32_0 = arith.constant 0 : i32
    %c0_i32_1 = arith.constant 0 : i32
    return %c0_i32, %c0_i32_0 : i32, i32
  }
  func.func @transform_6(%arg0: i32) -> (i32, i32) {
    %c0_i32 = arith.constant 0 : i32
    %c0_i32_0 = arith.constant 0 : i32
    %c0_i32_1 = arith.constant 0 : i32
    return %c0_i32, %c0_i32_0 : i32, i32
  }
  func.func @transform_7(%arg0: i32) -> (i32, i32) {
    %c0_i32 = arith.constant 0 : i32
    %c0_i32_0 = arith.constant 0 : i32
    %c0_i32_1 = arith.constant 0 : i32
    return %c0_i32, %c0_i32_0 : i32, i32
  }
  func.func @transform_8(%arg0: i32) -> (i32, i32) {
    %c0_i32 = arith.constant 0 : i32
    %c0_i32_0 = arith.constant 0 : i32
    %c0_i32_1 = arith.constant 0 : i32
    return %c0_i32, %c0_i32_0 : i32, i32
  }
  func.func @transform_9(%arg0: i32) -> (i32, i32) {
    %c0_i32 = arith.constant 0 : i32
    %c0_i32_0 = arith.constant 0 : i32
    %c0_i32_1 = arith.constant 0 : i32
    return %c0_i32, %c0_i32_0 : i32, i32
  }
  func.func @transform_10(%arg0: i32) -> (i32, i32) {
    %c0_i32 = arith.constant 0 : i32
    %c0_i32_0 = arith.constant 0 : i32
    %c0_i32_1 = arith.constant 0 : i32
    return %c0_i32, %c0_i32_0 : i32, i32
  }
  func.func @transform_11(%arg0: i32) -> (i32, i32, i32) {
    %c0_i32 = arith.constant 0 : i32
    %c0_i32_0 = arith.constant 0 : i32
    %c0_i32_1 = arith.constant 0 : i32
    return %arg0, %c0_i32, %c0_i32_0 : i32, i32, i32
  }
}

</mosaic_0001>

<bundles_post_ra>
// kernel: tpu_custom_call.1
= control target key start
LH: loop header
LB: loop body
LE: loop exit
PB: predicated region body
PF: predicated region fallthrough
CT: control target
= control target key end

     0   :  { %s2663_s0 = inlined_call_operand.vmem [shape: f32[64,16], index: 0, kind: input, shape index: {}]   ;;  %s2664_s1 = inlined_call_operand.vmem [shape: f32[64,8], index: 1, kind: input, shape index: {}]   ;;  %s2665_s2 = inlined_call_operand.vmem [shape: bf16[2,32,32], index: 2, kind: input, shape index: {}]   ;;  %s2666_s3 = inlined_call_operand.vmem [shape: bf16[2,32,32], index: 3, kind: input, shape index: {}]   ;;  %s2667_s4 = inlined_call_operand.vmem [shape: f32[64,1], index: 4, kind: input, shape index: {}]   ;;  %s2668_s5 = inlined_call_operand.vmem [shape: f32[16,256], index: 5, kind: input, shape index: {}]   ;;  %s2669_s6 = inlined_call_operand.vmem [shape: f32[1,256], index: 6, kind: input, shape index: {}]   ;;  %s2670_s7 = inlined_call_operand.vmem [shape: f32[128,128], index: 7, kind: input, shape index: {}]   ;;  %s2671_s8 = inlined_call_operand.hbm [shape: f32[8,128], index: 8, kind: input, shape index: {}]   ;;  %s2672_s9 = inlined_call_operand.vmem [shape: f32[1,128], index: 9, kind: input, shape index: {}]   ;;  %s2673_s10 = inlined_call_operand.hbm [shape: f32[128,128], index: 10, kind: input, shape index: {}]   ;;  %s2674_s11 = inlined_call_operand.hbm [shape: f32[2,4,128], index: 11, kind: output, shape index: {}]  }
   0x1   :  { %2678 = sst [smem:[#allocation12_spill]] %s2671_s8 }
   0x2   :  { %2679 = sst [smem:[#allocation13_spill]] %s2673_s10 }
   0x3   :  { %16 = vsyncpa [#allocation3], 0 }
   0x4   :  { %17 = vsyncpa [#allocation6], 0 }
   0x5   :  { %18 = vsyncpa [#allocation4], 0 }
   0x6   :  { %20 = vsyncpa [#allocation4 + $0x1], 0  ;;  %s2232_s17 = smov 0   ;;  %s2234_s18 = smov 0  }
   0x7   :  { %s2236_s19 = smov 0   ;;  %s2238_s20 = smov 0  }
   0x8 LB: > { %s2253_s21 = sadd.s32 4294967295, %s2163_s20   ;;  %s1634_s22 = sadd.s32 4294967294, %s2163_s20   ;;  %s2163_s20 = sphi %s2238_s20, %s2698_s20   ;;  %s2159_s19 = sphi %s2236_s19, %s2697_s19   ;;  %s2155_s18 = sphi %s2234_s18, %s2696_s18   ;;  %s2151_s17 = sphi %s2232_s17, %s2695_s17  }
   0x9   : > { %s2257_s23 = sadd.s32 1, %s2163_s20   ;;  %s289_s24 = sadd.s32 1, %s2159_s19 }
   0xa   : > { %s286_s25 = ssub.s32 %s2163_s20, %s2257_s23  ;;  %p299_p0 = scmp.ne.s32.totalorder %s2159_s19, %s2155_s18 }
   0xb   : > { %p287_p1 = scmp.eq.s32.totalorder %s286_s25, 0  ;;  %p300_p2 = scmp.eq.s32.totalorder %s2253_s21, 1 }
   0xc   : > { %p305_p3 = scmp.ne.s32.totalorder %s2155_s18, %s2151_s17  ;;  %p306_p4 = scmp.eq.s32.totalorder %s1634_s22, 1 }
   0xd   : > { %s2268_s26 = scalar_select %p287_p1, %s2159_s19, %s289_s24  }
   0xe   : > { %p2270_p5 = por %p300_p2, %p299_p0  ;;  %p2274_p6 = por %p306_p4, %p305_p3 }
   0xf   : > { %2680 = sst [smem:[#allocation11_spill]] %s2268_s26  ;;  %p1635_p7 = scmp.ge.s32.totalorder %s2163_s20, 1 }
  0x10   : > { %s2681_s27 = scalar_select %p2270_p5, 1, 0 }
  0x11   : > { %s2682_s28 = scalar_select %p2274_p6, 1, 0 }
  0x12   : > { %p313_p8 = scmp.lt.s32.totalorder %s2163_s20, 3  ;;  %p2675_p9 = scmp.eq.s32.totalorder %s2253_s21, 0 }
  0x13   : > { %s2165_s30 = smov [#allocation2]   ;;  %s2166_s13 = smov [#allocation5]  }
  0x14   : > { %p2281_p10 = pnand %p1635_p7, %p313_p8  ;;  %s335_s12 = sshll.u32 %s2165_s30, 4  ;;  %s336_s12 = int_to_ptr.vmem [resolvable:$true] %s335_s12 }
  0x15   : > { %s348_s14 = sshll.u32 %s2166_s13, 4  ;;  %s2054_s16 = scalar_lea.vmem %s336_s12, 128  ;;  %s349_s14 = int_to_ptr.vmem [resolvable:$true] %s348_s14 }
  0x16   : > { %s2683_s29 = scalar_select %p2281_p10, 1, 0 }
  0x17   : > { %p1987_p11 = pneg %p2281_p10  ;;  %p2055_p0 = scmp.ne.s32.totalorder %s336_s12, %s2054_s16 }
  0x18   : > { %p2062_p3 = scmp.lt.s32.totalorder %s336_s12, %s336_s12  ;;  %p2063_p4 = scmp.lt.s32.totalorder %s2054_s16, %s2054_s16 }
  0x19   : > { %p2289_p12 = pnand %p2675_p9, %p1987_p11 }
  0x1a   : > { %p2064_p7 = por %p2063_p4, %p2062_p3 }
  0x1b   : > { %p2045_p13 = pneg %p2289_p12 }
  0x1d   : > { %p2057_p1 = pnand %p2055_p0, %p2045_p13 }
  0x1f   : > { %p2058_p2 = pneg %p2057_p1 }
  0x21   : > { %p2065_p8 = pnand %p2064_p7, %p2058_p2 }
  0x23   : > { %2068 = shalt.err (!%p2065_p8)
}
  0x24   : > { %s2685_s8 = sld [smem:[#allocation12_spill]]  ;;  %s2080_s25 = scalar_lea.vmem %s349_s14, 2048 }
  0x25   : > { %p2081_p11 = scmp.ne.s32.totalorder %s349_s14, %s2080_s25  ;;  %p2088_p0 = scmp.lt.s32.totalorder %s349_s14, %s349_s14 }
  0x26   : > { %p2089_p1 = scmp.lt.s32.totalorder %s2080_s25, %s2080_s25 }
  0x27   : > { %p2083_p9 = pnand %p2081_p11, %p2045_p13 }
  0x28   : > { %p2090_p5 = por %p2089_p1, %p2088_p0 }
  0x29   : > { %p2084_p6 = pneg %p2083_p9 }
  0x2a   : > { %1990 = dma.hbm_to_vmem [thread:$0]  (!%p2289_p12), %s2685_s8, 128, %s336_s12, [#allocation3]  }
  0x2b   : > { %p2091_p10 = pnand %p2090_p5, %p2084_p6 }
  0x2d   : > { %2094 = shalt.err (!%p2091_p10)
}
  0x2e   : > { %s2167_s30 = smov 128   ;;  %s2168_s13 = smov 8  }
  0x2f   : > { %s2686_s10 = sld [smem:[#allocation13_spill]]  ;;  %p2687_p2 = scmp.ne.s32.totalorder %s2683_s29, 0 }
  0x30   : > { %p2688_p3 = scmp.eq.s32.totalorder (!%p2687_p2), %s2253_s21, 0 }
  0x31   : > { %407 = sbr.rel (%p2687_p2) target bundleno = 1524 (0x5f4), region = 64 }
  0x35   : > { %1993 = dma.hbm_to_vmem [thread:$0]  (!%p2289_p12), %s2686_s10, 2048, %s349_s14, [#allocation6], %s2167_s30, %s2167_s30, %s2168_s13  }
  0x36   : > { %2138 = dma.done.wait (%p2688_p3), [#allocation3], 128   ;;  %p2689_p9 = pmov %p2688_p3 }
  0x37   : > { %p2690_p5 = pmov %p2688_p3 }
  0x38   : > { %2140 = vsyncadd (%p2689_p9), [#allocation3], 4294967168 }
  0x39   : > { %2142 = dma.done.wait (%p2690_p5), [#allocation6], 2048   ;;  %p2691_p6 = pmov %p2688_p3 }
  0x3a   : > { %s1643_s26 = sshll.u32 %s2253_s21, 2  ;;  %v2169_v0 = vmov 0.0   ;;  %p483_p12 = scmp.lt.s32.totalorder %s2253_s21, 1  ;;  %v531_v1 = vld [vmem:[%s2668_s5 + $0x18] sm:$0xff]  ;;  %v530_v2 = vld [vmem:[%s2668_s5 + $0x10] sm:$0xff]  ;;  %v529_v3 = vld [vmem:[%s2668_s5 + $0x8] sm:$0xff]  ;;  %v534_v23 = vlaneseq }
  0x3b   : > { %2144 = vsyncadd (%p2691_p6), [#allocation6], 4294965248  ;;  %621 = vmatprep.mubr.f32.mxu0 %v2169_v0  ;;  %p472_p10 = scmp.lt.s32.totalorder %s1643_s26, 7  ;;  %585 = vmatprep.subr.mxu0 %v531_v1  ;;  %v528_v4 = vld [vmem:[%s2668_s5] sm:$0xff]  ;;  %vm544_vm0 = vcmask 130048   ;;  %vm662_vm1 = vcmask 261120  }
  0x3c   : > { %s2348_s22 = scalar_select %p483_p12, %s2253_s21, 1  ;;  %586 = vmatpush1.msra.mxu0 %v530_v2  ;;  %v760_v21 = vld [vmem:[#allocation2] sm:$0xff]  ;;  %v2383_v22 = vld [vmem:[%s2670_s7 + $0x78] sm:$0xff]  ;;  %v2388_v26 = vshrl.u32 %v534_v23, 7  ;;  %vm767_vm2 = vcmask 64512   ;;  %v2419_v46 = vld [vmem:[%s2670_s7 + $0x70] sm:$0xff] }
  0x3d   : > { %s2700_s26 = smov (!%p472_p10, %s1643_s26), 7  ;;  %587 = vmatprep.subr.mxu0 %v529_v3  ;;  %1813 = vmatprep.subr.mxu1 %v760_v21  ;;  %v2396_v30 = vld [vmem:[%s2669_s6] sm:$0x3]  ;;  %v2429_v49 = vld [vmem:[%s2670_s7 + $0x68] sm:$0xff]  ;;  %v2449_v53 = vld [vmem:[%s2670_s7 + $0x58] sm:$0xff]  ;;  %vm1483_vm3 = vcmask 1041409  }
  0x3e   : > { %s2323_s29 = sshll.u32 %s2700_s26, 3  ;;  %588 = vmatpush1.msra.mxu0 %v528_v4  ;;  %s1682_s8 = sshll.u32 %s2348_s22, 4  ;;  %1814 = vmatpush3.msra.mxu1 %v760_v21  ;;  %v536_v29 = vsub.s32 0, %v2388_v26  ;;  %v2438_v51 = vld [vmem:[%s2670_s7 + $0x60] sm:$0xff]  ;;  %v2458_v54 = vld [vmem:[%s2670_s7 + $0x50] sm:$0xff]  ;;  %v2467_v55 = vld [vmem:[%s2670_s7 + $0x48] sm:$0xff] }
  0x3f   : > { %s2329_s15 = scalar_lea.vmem %s2663_s0, %s2323_s29  ;;  %s481_s25 = scalar_lea.vmem %s2664_s1, %s2323_s29  ;;  %1835 = vmatprep.subr.mxu1 %v2383_v22  ;;  %v2476_v56 = vld [vmem:[%s2670_s7 + $0x40] sm:$0xff]  ;;  %v2483_v57 = vld [vmem:[%s2670_s7 + $0x38] sm:$0xff]  ;;  %v2490_v58 = vld [vmem:[%s2670_s7 + $0x30] sm:$0xff]  ;;  %vm1485_vm4 = vcmask 1042434   ;;  %vm1487_vm5 = vcmask 1043459  }
  0x40   : > { %v499_v5 = vld [vmem:[%s2329_s15] sm:$0xff]  ;;  %v661_v6 = vld [vmem:[%s481_s25 + $0x18] sm:$0xff]  ;;  %v660_v7 = vld [vmem:[%s481_s25 + $0x10] sm:$0xff]  ;;  %s492_s30 = scalar_lea.vmem %s2666_s3, %s1682_s8  ;;  %v537_v33 = vrot.slane %v2396_v30, %v536_v29  ;;  %s497_s12 = scalar_lea.vmem %s2667_s4, %s2323_s29 }
  0x41   : > { %1653 = vmatmul.mubr.msk.f32.vlgmr.msra.gmra.mxu0 %vm544_vm0, %v499_v5  ;;  %1799 = vmatprep.subr.mxu0 %v661_v6  ;;  %v500_v8 = vld [vmem:[%s2329_s15 + $0x8] sm:$0xff]  ;;  %v658_v10 = vld [vmem:[%s481_s25] sm:$0xff]  ;;  %v501_v11 = vld [vmem:[%s2329_s15 + $0x10] sm:$0xff]  ;;  %s468_s29 = sand.u32 1, %s2155_s18   ;;  %s1679_s22 = sshll.u32 %s2253_s21, 6 }
  0x42   : > { %627 = vmatprep.mubr.f32.mxu0 %v2169_v0  ;;  %1800 = vmatpush3.msra.mxu0 %v661_v6  ;;  %v659_v9 = vld [vmem:[%s481_s25 + $0x8] sm:$0xff]  ;;  %v1693_v12 = vld [vmem:[%s492_s30] sm:$0xff]   ;;  %v502_v13 = vld [vmem:[%s2329_s15 + $0x18] sm:$0xff]  ;;  %s2373_s15 = scalar_lea.vmem %s2665_s2, %s1682_s8  ;;  %s1642_s14 = sshll.u32 %s468_s29, 2 }
  0x43   : > { %1801 = vmatprep.subr.mxu0 %v660_v7  ;;  %v1694_v14 = vunpack.c.l.bf16 %v1693_v12  ;;  %v1695_v15 = vunpack.c.h.bf16 %v1693_v12  ;;  %v1701_v16 = vld [vmem:[%s492_s30 + $0x8] sm:$0xff]   ;;  %v1685_v19 = vld [vmem:[%s2373_s15] sm:$0xff]   ;;  %v2511_v61 = vld [vmem:[%s2670_s7 + $0x18] sm:$0xff]  ;;  %s470_s8 = scalar_lea.vmem [#allocation7], %s1642_s14  ;;  %s2628_s25 = scalar_lea.hbm %s2674_s11, %s1679_s22 }
  0x44   : > { %1802 = vmatpush3.msra.mxu0 %v660_v7  ;;  %v1698_v17 = vunpack.c.l.bf16 %v1701_v16  ;;  %v1699_v18 = vunpack.c.h.bf16 %v1701_v16  ;;  %v2376_v20 = vunpack.c.l.bf16 %v1685_v19  ;;  %v1700_v45 = vld [vmem:[%s2373_s15 + $0x8] sm:$0xff]   ;;  %v2423_v48 = vunpack.c.h.bf16 %v1685_v19  ;;  %v2504_v60 = vld [vmem:[%s2670_s7 + $0x20] sm:$0xff]  ;;  %v2518_v62 = vld [vmem:[%s2670_s7 + $0x10] sm:$0xff]  ;;  %s1505_s10 = sshll.u32 %s470_s8, 4  ;;  %s1492_s13 = scalar_lea.sflag [#allocation4], %s468_s29  ;;  %s1506_s10 = int_to_ptr.vmem [resolvable:$true] %s1505_s10 }
  0x45   : > { %1654 = vmatmul.mubr.msk.f32.gmra.mxu0 %vm544_vm0, %v500_v8  ;;  %1803 = vmatprep.subr.mxu0 %v659_v9  ;;  %v2431_v50 = vunpack.c.l.bf16 %v1700_v45  ;;  %v2443_v52 = vunpack.c.h.bf16 %v1700_v45  ;;  %v2497_v59 = vld [vmem:[%s2670_s7 + $0x28] sm:$0xff]  ;;  %v2536_v2 = vld [vmem:[%s2670_s7] sm:$0xff]  ;;  %s2095_s15 = scalar_lea.vmem %s1506_s10, 64  ;;  %p2692_p4 = scmp.ne.s32.totalorder %s2681_s27, 0 }
  0x46   : > { %633 = vmatprep.mubr.f32.mxu0 %v2169_v0  ;;  %1804 = vmatpush3.msra.mxu0 %v659_v9  ;;  %v2529_v1 = vld [vmem:[%s2670_s7 + $0x8] sm:$0xff]  ;;  %p2096_p13 = scmp.ne.s32.totalorder %s1506_s10, %s2095_s15  ;;  %s2171_s21 = smov [#allocation7]  }
  0x47   : > { %1805 = vmatprep.subr.mxu0 %v658_v10  ;;  %s2099_s16 = sshll.u32 %s2171_s21, 4  ;;  %s2100_s16 = int_to_ptr.vmem [resolvable:$false] %s2099_s16 }
  0x48   : > { %1806 = vmatpush3.msra.mxu0 %v658_v10  ;;  %p2097_p7 = pnand %p2096_p13, %p2692_p4  ;;  %s2101_s26 = scalar_lea.vmem %s2100_s16, 128 }
  0x49   : > { %1655 = vmatmul.mubr.msk.f32.gmra.mxu0 %vm544_vm0, %v501_v11  ;;  %v1661_v11 = vld [vmem:[%s2672_s9] ss:$0 sm:$0xff]  ;;  %p2102_p11 = scmp.lt.s32.totalorder %s1506_s10, %s2100_s16  ;;  %p2103_p0 = scmp.lt.s32.totalorder %s2101_s26, %s2095_s15 }
  0x4a   : > { %639 = vmatprep.mubr.f32.mxu0 %v2169_v0  ;;  %p2098_p8 = pneg %p2097_p7 }
  0x4b   : > { %p2104_p1 = por %p2103_p0, %p2102_p11 }
  0x4d   : > { %1656 = vmatmul.mubr.msk.f32.gmra.mxu0 %vm544_vm0, %v502_v13  ;;  %p2105_p2 = pnand %p2104_p1, %p2098_p8 }
  0x4e   : > { %1807 = vmatprep.mubr.msk.f32.mxu0 %vm662_vm1, %v1694_v14 }
  0x51   : > { %1808 = vmatmul.mubr.msk.f32.vlgmr.msra.gmra.mxu0 %vm662_vm1, %v1695_v15 }
  0x52   : > { %1810 = vmatprep.mubr.msk.f32.mxu0 %vm662_vm1, %v1698_v17 }
  0x55   : > { %1811 = vmatmul.mubr.msk.f32.gmra.mxu0 %vm662_vm1, %v1699_v18 }
  0x56   : > { %1829 = vmatprep.mubr.msk.f32.mxu0 %vm662_vm1, %v2376_v20 }
 0x101   : > { %v623_v24 = vpop.f32.mrf.mxu0 }
 0x102   : > { %v2410_v41 = vadd.f32 %v623_v24, %v537_v33 }
 0x103   : > { %v2386_v25 = vpop.f32.mrf.mxu0 }
 0x104   : > { %v646_v47 = vmax.f32 %v2410_v41, 0.0 }
 0x105   : > { %v629_v27 = vpop.f32.mrf.mxu0 }
 0x106   : > { %v2407_v38 = vadd.f32 %v629_v27, %v537_v33 }
 0x107   : > { %v2390_v28 = vpop.f32.mrf.mxu0 }
 0x108   : > { %v647_v44 = vmax.f32 %v2407_v38, 0.0 }
 0x109   : > { %v635_v31 = vpop.f32.mrf.mxu0 }
 0x10a   : > { %v2401_v35 = vadd.f32 %v635_v31, %v537_v33 }
 0x10b   : > { %v2398_v32 = vpop.f32.mrf.mxu0 }
 0x10c   : > { %v648_v42 = vmax.f32 %v2401_v35, 0.0 }
 0x10d   : > { %v641_v34 = vpop.f32.mrf.mxu0 }
 0x10e   : > { %v2403_v36 = vadd.f32 %v641_v34, %v537_v33 }
 0x10f   : > { %v2405_v37 = vpop.f32.mrf.mxu0 }
 0x110   : > { %v649_v39 = vmax.f32 %v2403_v36, 0.0 }
 0x111   : > { %v1809_v40 = vpop.f32.mrf.mxu0 }
 0x112   : > { %1821 = vmatprep.subr.mxu0 %v649_v39 }
 0x113   : > { %1822 = vmatpush3.msra.mxu0 %v649_v39  ;;  %v741_v43 = vpop.f32.mrf.mxu0 }
 0x114   : > { %1823 = vmatprep.subr.mxu0 %v648_v42  ;;  %1815 = vmatprep.mubr.msk.f32.mxu1 %vm767_vm2, %v741_v43 }
 0x115   : > { %1824 = vmatpush3.msra.mxu0 %v648_v42  ;;  %1816 = vmatmul.mubr.msk.f32.vlgmr.msra.gmra.mxu1 %vm767_vm2, %v1809_v40  ;;  %v1812_v63 = vpop.f32.mrf.mxu0 }
 0x116   : > { %1825 = vmatprep.subr.mxu0 %v647_v44  ;;  %1836 = vmatpush3.msra.mxu1 %v2383_v22 }
 0x117   : > { %1826 = vmatpush3.msra.mxu0 %v647_v44  ;;  %1837 = vmatprep.subr.mxu1 %v2419_v46  ;;  %v751_v0 = vpop.f32.mrf.mxu0 }
 0x118   : > { %1827 = vmatprep.subr.mxu0 %v646_v47  ;;  %1838 = vmatpush3.msra.mxu1 %v2419_v46 }
 0x119   : > { %1828 = vmatpush3.msra.mxu0 %v646_v47  ;;  %1839 = vmatprep.subr.mxu1 %v2429_v49 }
 0x11a   : > { %1830 = vmatmul.mubr.msk.f32.vlgmr.msra.gmra.mxu0 %vm662_vm1, %v2423_v48  ;;  %1840 = vmatpush3.msra.mxu1 %v2429_v49 }
 0x11b   : > { %1832 = vmatprep.mubr.msk.f32.mxu0 %vm662_vm1, %v2431_v50  ;;  %1841 = vmatprep.subr.mxu1 %v2438_v51 }
 0x11c   : > { %1842 = vmatpush3.msra.mxu1 %v2438_v51  ;;  %1818 = vmatprep.mubr.msk.f32.mxu1 %vm767_vm2, %v751_v0 }
 0x11d   : > { %1843 = vmatprep.subr.mxu1 %v2449_v53  ;;  %1819 = vmatmul.mubr.msk.f32.gmra.mxu1 %vm767_vm2, %v1812_v63 }
 0x11e   : > { %1833 = vmatmul.mubr.msk.f32.gmra.mxu0 %vm662_vm1, %v2443_v52  ;;  %1844 = vmatpush3.msra.mxu1 %v2449_v53 }
 0x11f   : > { %1845 = vmatprep.subr.mxu1 %v2458_v54  ;;  %1881 = vmatprep.mubr.msk.f32.mxu0 %vm662_vm1, %v2376_v20 }
 0x120   : > { %1846 = vmatpush3.msra.mxu1 %v2458_v54 }
 0x121   : > { %1847 = vmatprep.subr.mxu1 %v2467_v55 }
 0x122   : > { %1848 = vmatpush3.msra.mxu1 %v2467_v55 }
 0x123   : > { %1849 = vmatprep.subr.mxu1 %v2476_v56 }
 0x124   : > { %1850 = vmatpush3.msra.mxu1 %v2476_v56 }
 0x125   : > { %1851 = vmatprep.subr.mxu1 %v2483_v57 }
 0x126   : > { %1852 = vmatpush3.msra.mxu1 %v2483_v57 }
 0x127   : > { %1853 = vmatprep.subr.mxu1 %v2490_v58 }
 0x128   : > { %1854 = vmatpush3.msra.mxu1 %v2490_v58 }
 0x129   : > { %1855 = vmatprep.subr.mxu1 %v2497_v59 }
 0x12a   : > { %1856 = vmatpush3.msra.mxu1 %v2497_v59 }
 0x12b   : > { %1857 = vmatprep.subr.mxu1 %v2504_v60 }
 0x12c   : > { %1858 = vmatpush3.msra.mxu1 %v2504_v60 }
 0x12d   : > { %1859 = vmatprep.subr.mxu1 %v2511_v61 }
 0x12e   : > { %1860 = vmatpush3.msra.mxu1 %v2511_v61 }
 0x12f   : > { %1861 = vmatprep.subr.mxu1 %v2518_v62 }
 0x130   : > { %1862 = vmatpush3.msra.mxu1 %v2518_v62 }
 0x131   : > { %1863 = vmatprep.subr.mxu1 %v2529_v1 }
 0x132   : > { %1864 = vmatpush3.msra.mxu1 %v2529_v1 }
 0x133   : > { %1865 = vmatprep.subr.mxu1 %v2536_v2 }
 0x134   : > { %1866 = vmatpush3.msra.mxu1 %v2536_v2 }
 0x1d5   : > { %v1817_v7 = vpop.f32.mrf.mxu1 }
 0x1d6   : > { %v2545_v14 = vadd.f32 %v1817_v7, %v1661_v11  ;;  %v1320_v7 = vld [vmem:[#allocation5 + $0x10] sm:$0xff] }
 0x1d7   : > { %v846_v8 = vpop.f32.mrf.mxu1 }
 0x1d8   : > { %v2549_v17 = vadd.f32 %v1661_v11, %v846_v8  ;;  %v1319_v8 = vld [vmem:[#allocation5 + $0x8] sm:$0xff] }
 0x1da   : > { %v1831_v3 = vpop.f32.mrf.mxu0 }
 0x1dc   : > { %v943_v4 = vpop.f32.mrf.mxu0 }
 0x1dd   : > { %1867 = vmatprep.mubr.f32.mxu1 %v943_v4  ;;  %v1820_v9 = vpop.f32.mrf.mxu1  ;;  %v1324_v4 = vld [vmem:[#allocation5 + $0x30] sm:$0xff] }
 0x1de   : > { %v1834_v5 = vpop.f32.mrf.mxu0  ;;  %1868 = vmatmul.mubr.f32.vlgmr.msra.gmra.mxu1 %v1831_v3  ;;  %v2547_v15 = vadd.f32 %v1820_v9, %v1661_v11  ;;  %v1325_v3 = vld [vmem:[#allocation5 + $0x38] sm:$0xff]  ;;  %v1318_v9 = vld [vmem:[#allocation5] sm:$0xff] }
 0x1df   : > { %v856_v10 = vpop.f32.mrf.mxu1 }
 0x1e0   : > { %v953_v6 = vpop.f32.mrf.mxu0  ;;  %v2551_v18 = vadd.f32 %v1661_v11, %v856_v10  ;;  %v2170_v10 = vmov 0   ;;  %v1427_v11 = vld [vmem:[%s497_s12] sm:$0xff] }
 0x1e1   : > { %1870 = vmatprep.mubr.f32.mxu1 %v953_v6  ;;  %v1321_v6 = vld [vmem:[#allocation5 + $0x18] sm:$0xff]  ;;  %2041 = vset.pattern.permute.xlu0 %v2170_v10 }
 0x1e2   : > { %1871 = vmatmul.mubr.f32.gmra.mxu1 %v1834_v5  ;;  %v1322_v5 = vld [vmem:[#allocation5 + $0x20] sm:$0xff]  ;;  %2042 = vset.pattern.permute.xlu1 %v2170_v10 }
 0x1e3   : > { %1933 = vmatprep.mubr.msk.f32.mxu1 %vm662_vm1, %v2376_v20  ;;  %1433 = vperm.xlu0 %2041, %v1427_v11  }
 0x29e   : > { %v1869_v12 = vpop.f32.mrf.mxu1 }
 0x29f   : > { %v1034_v19 = vadd.f32 %v1869_v12, %v2545_v14  ;;  %v1429_v12 = vld [vmem:[%s497_s12 + $0x10] sm:$0xff] }
 0x2a0   : > { %v1028_v13 = vpop.f32.mrf.mxu1  ;;  %1443 = vperm.xlu1 %2042, %v1429_v12  }
 0x2a1   : > { %v1029_v23 = vadd.f32 %v1028_v13, %v2549_v17  ;;  %v1048_v29 = vadd.f32 %v1034_v19, %v2407_v38  ;;  %v1428_v13 = vld [vmem:[%s497_s12 + $0x8] sm:$0xff]  ;;  %v540_v19 = vsub.s32 1, %v2388_v26 }
 0x2a2   : > { %v1872_v16 = vpop.f32.mrf.mxu1  ;;  %1438 = vperm.xlu0 %2041, %v1428_v13  }
 0x2a3   : > { %v1044_v20 = vadd.f32 %v1872_v16, %v2547_v15  ;;  %v1047_v34 = vadd.f32 %v1029_v23, %v2410_v41  ;;  %v1052_v40 = vmax.f32 %v1048_v29, 0.0 }
 0x2a4   : > { %v1038_v21 = vpop.f32.mrf.mxu1 }
 0x2a5   : > { %v1050_v24 = vadd.f32 %v1044_v20, %v2403_v36  ;;  %v1039_v27 = vadd.f32 %v1038_v21, %v2551_v18  ;;  %v1051_v42 = vmax.f32 %v1047_v34, 0.0  ;;  %v1434_v20 = vpop.permute.xlu0 %1433  ;;  %v541_v21 = vrot.slane %v2396_v30, %v540_v19 }
 0x2a7   : > { %v1054_v31 = vmax.f32 %v1050_v24, 0.0  ;;  %v1049_v33 = vadd.f32 %v1039_v27, %v2401_v35  ;;  %v632_v23 = vadd.f32 %v2390_v28, %v541_v21  ;;  %v626_v29 = vadd.f32 %v2386_v25, %v541_v21 }
 0x2a9   : > { %v1053_v39 = vmax.f32 %v1049_v33, 0.0  ;;  %1873 = vmatprep.subr.mxu0 %v1054_v31 }
 0x2aa   : > { %1874 = vmatpush3.msra.mxu0 %v1054_v31 }
 0x2ab   : > { %1875 = vmatprep.subr.mxu0 %v1053_v39 }
 0x2ac   : > { %1876 = vmatpush3.msra.mxu0 %v1053_v39  ;;  %v644_v39 = vadd.f32 %v2405_v37, %v541_v21 }
 0x2ad   : > { %1877 = vmatprep.subr.mxu0 %v1052_v40 }
 0x2ae   : > { %1878 = vmatpush3.msra.mxu0 %v1052_v40 }
 0x2af   : > { %1879 = vmatprep.subr.mxu0 %v1051_v42 }
 0x2b0   : > { %1880 = vmatpush3.msra.mxu0 %v1051_v42 }
 0x2b1   : > { %1882 = vmatmul.mubr.msk.f32.vlgmr.msra.gmra.mxu0 %vm662_vm1, %v2423_v48  ;;  %1887 = vmatprep.subr.mxu0 %v2383_v22 }
 0x2b2   : > { %1884 = vmatprep.mubr.msk.f32.mxu0 %vm662_vm1, %v2431_v50  ;;  %1888 = vmatpush3.msra.mxu0 %v2383_v22 }
 0x2b3   : > { %1889 = vmatprep.subr.mxu0 %v2419_v46 }
 0x2b4   : > { %1890 = vmatpush3.msra.mxu0 %v2419_v46 }
 0x2b5   : > { %1885 = vmatmul.mubr.msk.f32.gmra.mxu0 %vm662_vm1, %v2443_v52  ;;  %1891 = vmatprep.subr.mxu0 %v2429_v49 }
 0x2b6   : > { %1892 = vmatpush3.msra.mxu0 %v2429_v49 }
 0x2b7   : > { %1893 = vmatprep.subr.mxu0 %v2438_v51 }
 0x2b8   : > { %1894 = vmatpush3.msra.mxu0 %v2438_v51 }
 0x2b9   : > { %1895 = vmatprep.subr.mxu0 %v2449_v53 }
 0x2ba   : > { %1896 = vmatpush3.msra.mxu0 %v2449_v53 }
 0x2bb   : > { %1897 = vmatprep.subr.mxu0 %v2458_v54 }
 0x2bc   : > { %1898 = vmatpush3.msra.mxu0 %v2458_v54 }
 0x2bd   : > { %1899 = vmatprep.subr.mxu0 %v2467_v55 }
 0x2be   : > { %1900 = vmatpush3.msra.mxu0 %v2467_v55 }
 0x2bf   : > { %1901 = vmatprep.subr.mxu0 %v2476_v56 }
 0x2c0   : > { %1902 = vmatpush3.msra.mxu0 %v2476_v56 }
 0x2c1   : > { %1903 = vmatprep.subr.mxu0 %v2483_v57 }
 0x2c2   : > { %1904 = vmatpush3.msra.mxu0 %v2483_v57 }
 0x2c3   : > { %1905 = vmatprep.subr.mxu0 %v2490_v58 }
 0x2c4   : > { %1906 = vmatpush3.msra.mxu0 %v2490_v58 }
 0x2c5   : > { %1907 = vmatprep.subr.mxu0 %v2497_v59 }
 0x2c6   : > { %1908 = vmatpush3.msra.mxu0 %v2497_v59 }
 0x2c7   : > { %1909 = vmatprep.subr.mxu0 %v2504_v60 }
 0x2c8   : > { %1910 = vmatpush3.msra.mxu0 %v2504_v60 }
 0x2c9   : > { %1911 = vmatprep.subr.mxu0 %v2511_v61 }
 0x2ca   : > { %1912 = vmatpush3.msra.mxu0 %v2511_v61 }
 0x2cb   : > { %1913 = vmatprep.subr.mxu0 %v2518_v62 }
 0x2cc   : > { %1914 = vmatpush3.msra.mxu0 %v2518_v62 }
 0x2cd   : > { %1915 = vmatprep.subr.mxu0 %v2529_v1 }
 0x2ce   : > { %1916 = vmatpush3.msra.mxu0 %v2529_v1  ;;  %v1333_v1 = vld [vmem:[#allocation5 + $0x78] sm:$0xff] }
 0x2cf   : > { %1917 = vmatprep.subr.mxu0 %v2536_v2 }
 0x2d0   : > { %1918 = vmatpush3.msra.mxu0 %v2536_v2  ;;  %v1328_v2 = vld [vmem:[#allocation5 + $0x50] sm:$0xff] }
 0x31b   : > { %v1444_v27 = vpop.permute.xlu1 %1443 }
 0x31d   : > { %v1439_v34 = vpop.permute.xlu0 %1438 }
 0x371   : > { %v1883_v22 = vpop.f32.mrf.mxu0 }
 0x373   : > { %v1121_v43 = vpop.f32.mrf.mxu0 }
 0x374   : > { %1919 = vmatprep.mubr.f32.mxu0 %v1121_v43  ;;  %v638_v43 = vadd.f32 %v2398_v32, %v541_v21 }
 0x375   : > { %v1886_v44 = vpop.f32.mrf.mxu0  ;;  %1920 = vmatmul.mubr.f32.vlgmr.msra.gmra.mxu0 %v1883_v22 }
 0x377   : > { %v1131_v45 = vpop.f32.mrf.mxu0 }
 0x378   : > { %1922 = vmatprep.mubr.f32.mxu0 %v1131_v45 }
 0x379   : > { %1923 = vmatmul.mubr.f32.gmra.mxu0 %v1886_v44 }
 0x435   : > { %v1921_v46 = vpop.f32.mrf.mxu0 }
 0x436   : > { %v1212_v51 = vadd.f32 %v1921_v46, %v2545_v14  ;;  %v1430_v14 = vld [vmem:[%s497_s12 + $0x18] sm:$0xff] }
 0x437   : > { %v1206_v47 = vpop.f32.mrf.mxu0  ;;  %1448 = vperm.xlu1 %2042, %v1430_v14  }
 0x438   : > { %v1207_v55 = vadd.f32 %v1206_v47, %v2549_v17  ;;  %v1226_v58 = vadd.f32 %v1212_v51, %v2407_v38  ;;  %v1330_v38 = vld [vmem:[#allocation5 + $0x60] sm:$0xff] }
 0x439   : > { %v1924_v49 = vpop.f32.mrf.mxu0 }
 0x43a   : > { %v1222_v53 = vadd.f32 %v1924_v49, %v2547_v15  ;;  %v1225_v61 = vadd.f32 %v1207_v55, %v2410_v41  ;;  %v1230_v63 = vmax.f32 %v1226_v58, 0.0  ;;  %v1329_v41 = vld [vmem:[#allocation5 + $0x58] sm:$0xff] }
 0x43b   : > { %v1216_v54 = vpop.f32.mrf.mxu0 }
 0x43c   : > { %v1228_v56 = vadd.f32 %v1222_v53, %v2403_v36  ;;  %v1217_v57 = vadd.f32 %v1216_v54, %v2551_v18  ;;  %v1229_v0 = vmax.f32 %v1225_v61, 0.0  ;;  %v1332_v36 = vld [vmem:[#allocation5 + $0x70] sm:$0xff] }
 0x43e   : > { %v1232_v59 = vmax.f32 %v1228_v56, 0.0  ;;  %v1227_v60 = vadd.f32 %v1217_v57, %v2401_v35  ;;  %v1331_v35 = vld [vmem:[#allocation5 + $0x68] sm:$0xff] }
 0x440   : > { %v1231_v62 = vmax.f32 %v1227_v60, 0.0  ;;  %1925 = vmatprep.subr.mxu1 %v1232_v59 }
 0x441   : > { %1926 = vmatpush3.msra.mxu1 %v1232_v59 }
 0x442   : > { %1927 = vmatprep.subr.mxu1 %v1231_v62 }
 0x443   : > { %1928 = vmatpush3.msra.mxu1 %v1231_v62 }
 0x444   : > { %1929 = vmatprep.subr.mxu1 %v1230_v63 }
 0x445   : > { %1930 = vmatpush3.msra.mxu1 %v1230_v63 }
 0x446   : > { %1931 = vmatprep.subr.mxu1 %v1229_v0 }
 0x447   : > { %1932 = vmatpush3.msra.mxu1 %v1229_v0 }
 0x448   : > { %1934 = vmatmul.mubr.msk.f32.vlgmr.msra.gmra.mxu1 %vm662_vm1, %v2423_v48  ;;  %1939 = vmatprep.subr.mxu1 %v1333_v1  ;;  %v1327_v48 = vld [vmem:[#allocation5 + $0x48] sm:$0xff] }
 0x449   : > { %1936 = vmatprep.mubr.msk.f32.mxu1 %vm662_vm1, %v2431_v50  ;;  %1940 = vmatpush3.msra.mxu1 %v1333_v1  ;;  %v1326_v50 = vld [vmem:[#allocation5 + $0x40] sm:$0xff] }
 0x44a   : > { %1941 = vmatprep.subr.mxu1 %v1332_v36 }
 0x44b   : > { %1942 = vmatpush3.msra.mxu1 %v1332_v36 }
 0x44c   : > { %1937 = vmatmul.mubr.msk.f32.gmra.mxu1 %vm662_vm1, %v2443_v52  ;;  %1943 = vmatprep.subr.mxu1 %v1331_v35  ;;  %v1323_v52 = vld [vmem:[#allocation5 + $0x28] sm:$0xff] }
 0x44d   : > { %1944 = vmatpush3.msra.mxu1 %v1331_v35 }
 0x44e   : > { %1945 = vmatprep.subr.mxu1 %v1330_v38 }
 0x44f   : > { %1946 = vmatpush3.msra.mxu1 %v1330_v38 }
 0x450   : > { %1947 = vmatprep.subr.mxu1 %v1329_v41 }
 0x451   : > { %1948 = vmatpush3.msra.mxu1 %v1329_v41 }
 0x452   : > { %1949 = vmatprep.subr.mxu1 %v1328_v2 }
 0x453   : > { %1950 = vmatpush3.msra.mxu1 %v1328_v2 }
 0x454   : > { %1951 = vmatprep.subr.mxu1 %v1327_v48 }
 0x455   : > { %1952 = vmatpush3.msra.mxu1 %v1327_v48 }
 0x456   : > { %1953 = vmatprep.subr.mxu1 %v1326_v50 }
 0x457   : > { %1954 = vmatpush3.msra.mxu1 %v1326_v50 }
 0x458   : > { %1955 = vmatprep.subr.mxu1 %v1325_v3 }
 0x459   : > { %1956 = vmatpush3.msra.mxu1 %v1325_v3 }
 0x45a   : > { %1957 = vmatprep.subr.mxu1 %v1324_v4 }
 0x45b   : > { %1958 = vmatpush3.msra.mxu1 %v1324_v4 }
 0x45c   : > { %1959 = vmatprep.subr.mxu1 %v1323_v52 }
 0x45d   : > { %1960 = vmatpush3.msra.mxu1 %v1323_v52 }
 0x45e   : > { %1961 = vmatprep.subr.mxu1 %v1322_v5 }
 0x45f   : > { %1962 = vmatpush3.msra.mxu1 %v1322_v5 }
 0x460   : > { %1963 = vmatprep.subr.mxu1 %v1321_v6 }
 0x461   : > { %1964 = vmatpush3.msra.mxu1 %v1321_v6 }
 0x462   : > { %1965 = vmatprep.subr.mxu1 %v1320_v7 }
 0x463   : > { %1966 = vmatpush3.msra.mxu1 %v1320_v7 }
 0x464   : > { %1967 = vmatprep.subr.mxu1 %v1319_v8 }
 0x465   : > { %1968 = vmatpush3.msra.mxu1 %v1319_v8 }
 0x466   : > { %1969 = vmatprep.subr.mxu1 %v1318_v9 }
 0x467   : > { %1970 = vmatpush3.msra.mxu1 %v1318_v9 }
 0x4b2   : > { %v1449_v46 = vpop.permute.xlu1 %1448 }
 0x508   : > { %v1935_v15 = vpop.f32.mrf.mxu1 }
 0x50a   : > { %v1299_v16 = vpop.f32.mrf.mxu1 }
 0x50b   : > { %1971 = vmatprep.mubr.f32.mxu1 %v1299_v16 }
 0x50c   : > { %v1938_v17 = vpop.f32.mrf.mxu1  ;;  %1972 = vmatmul.mubr.f32.vlgmr.msra.gmra.mxu1 %v1935_v15 }
 0x50e   : > { %v1309_v18 = vpop.f32.mrf.mxu1 }
 0x50f   : > { %1974 = vmatprep.mubr.f32.mxu1 %v1309_v18 }
 0x510   : > { %1975 = vmatmul.mubr.f32.gmra.mxu1 %v1938_v17 }
 0x5cc   : > { %v1973_v24 = vpop.f32.mrf.mxu1 }
 0x5cd   : > { %v1420_v31 = vadd.f32 %v1973_v24, %v632_v23 }
 0x5ce   : > { %v1400_v33 = vpop.f32.mrf.mxu1 }
 0x5cf   : > { %v1424_v40 = vmax.f32 %v1420_v31, 0.0  ;;  %v1419_v42 = vadd.f32 %v1400_v33, %v626_v29 }
 0x5d0   : > { %v1976_v22 = vpop.f32.mrf.mxu1 }
 0x5d1   : > { %v1423_v26 = vmax.f32 %v1419_v42, 0.0  ;;  %v1452_v44 = vmul.f32 %v1439_v34, %v1424_v40  ;;  %v1422_v45 = vadd.f32 %v1976_v22, %v644_v39 }
 0x5d2   : > { %v1410_v30 = vpop.f32.mrf.mxu1 }
 0x5d3   : > { %v1451_v28 = vmul.f32 %v1434_v20, %v1423_v26  ;;  %v1461_v47 = vrot.slane %v1452_v44, 4  ;;  %v1426_v49 = vmax.f32 %v1422_v45, 0.0  ;;  %v1421_v25 = vadd.f32 %v1410_v30, %v638_v43 }
 0x5d5   : > { %v1455_v51 = vrot.slane %v1451_v28, 4  ;;  %v1462_v53 = vmax.f32 %v1452_v44, %v1461_v47  ;;  %v1425_v54 = vmax.f32 %v1421_v25, 0.0  ;;  %v1454_v55 = vmul.f32 %v1449_v46, %v1426_v49 }
 0x5d7   : > { %v1456_v37 = vmax.f32 %v1451_v28, %v1455_v51  ;;  %v1463_v56 = vrot.slane %v1462_v53, 2  ;;  %v1453_v57 = vmul.f32 %v1444_v27, %v1425_v54  ;;  %v1473_v58 = vrot.slane %v1454_v55, 4 }
 0x5d9   : > { %v1457_v59 = vrot.slane %v1456_v37, 2  ;;  %v1464_v32 = vmax.f32 %v1462_v53, %v1463_v56  ;;  %v1467_v60 = vrot.slane %v1453_v57, 4  ;;  %v1474_v61 = vmax.f32 %v1454_v55, %v1473_v58 }
 0x5db   : > { %v1458_v62 = vmax.f32 %v1456_v37, %v1457_v59  ;;  %v1465_v63 = vrot.slane %v1464_v32, 1  ;;  %v1468_v0 = vmax.f32 %v1453_v57, %v1467_v60  ;;  %v1475_v1 = vrot.slane %v1474_v61, 2 }
 0x5dd   : > { %v1459_v36 = vrot.slane %v1458_v62, 1  ;;  %v1469_v35 = vrot.slane %v1468_v0, 2  ;;  %v1476_v38 = vmax.f32 %v1474_v61, %v1475_v1  ;;  %v1466_v2 = vmax.f32 %v1464_v32, %v1465_v63 }
 0x5df   : > { %v1460_v41 = vmax.f32 %v1458_v62, %v1459_v36  ;;  %v1470_v48 = vmax.f32 %v1468_v0, %v1469_v35  ;;  %v1477_v50 = vrot.slane %v1476_v38, 1 }
 0x5e1   : > { %v1484_v3 = vsel %vm1483_vm3, %v1466_v2, %v1460_v41  ;;  %v1471_v4 = vrot.slane %v1470_v48, 1  ;;  %v1478_v5 = vmax.f32 %v1476_v38, %v1477_v50 }
 0x5e3   : > { %v1472_v52 = vmax.f32 %v1470_v48, %v1471_v4 }
 0x5e5   : > { %v1486_v6 = vsel %vm1485_vm4, %v1472_v52, %v1484_v3 }
 0x5e6   : > { %v1488_v7 = vsel %vm1487_vm5, %v1478_v5, %v1486_v6 }
 0x5e7   : > { %1490 = vst [vmem:[%s470_s8] sm:$0xf] %v1488_v7 }
 0x5e8   : > { %2108 = shalt.err (!%p2105_p2)
}
 0x5e9   : > { %s2109_s12 = scalar_lea.hbm %s2628_s25, 64  ;;  %s2113_s22 = scalar_lea.hbm %s2674_s11, 128 }
 0x5ea   : > { %p2110_p3 = scmp.ne.s32.totalorder %s2628_s25, %s2109_s12  ;;  %p2114_p6 = scmp.lt.s32.totalorder %s2628_s25, %s2674_s11 }
 0x5eb   : > { %p2115_p10 = scmp.lt.s32.totalorder %s2113_s22, %s2109_s12 }
 0x5ec   : > { %p2111_p9 = pnand %p2110_p3, %p2692_p4 }
 0x5ed   : > { %p2116_p12 = por %p2115_p10, %p2114_p6 }
 0x5ee   : > { %p2112_p5 = pneg %p2111_p9 }
 0x5f0   : > { %p2117_p13 = pnand %p2116_p12, %p2112_p5 }
 0x5f2   : > { %2120 = shalt.err (!%p2117_p13)
}
 0x5f3   : > { %1985 = dma.vmem_to_hbm [thread:$0]  (%p2692_p4), %s1506_s10, 64, %s2628_s25, %s1492_s13  }
 0x5f4 PF: > { %p2002_p7 = scmp.ge.s32.totalorder %s2163_s20, 2  ;;  %s1517_s30 = sand.u32 1, %s2151_s17  }
 0x5f5   : > { %p2693_p8 = scmp.ne.s32.totalorder %s2682_s28, 0  ;;  %s1518_s15 = scalar_lea.sflag [#allocation4], %s1517_s30 }
 0x5f7   : > { %p1995_p11 = pnand %p2002_p7, %p2693_p8 }
 0x5f9   : > { %p1996_p0 = pneg %p1995_p11 }
 0x5fb   : > { %2146 = dma.done.wait (%p1996_p0), %s1518_s15, 64  }
 0x5fc   : > { %2148 = vsyncadd (%p1996_p0), %s1518_s15, 4294967232  ;;  %s2694_s21 = sld [smem:[#allocation11_spill]]  ;;  %p23_p1 = scmp.ge.s32.totalorder %s2257_s23, 4  }
 0x5fd   : > { %s2695_s17 = smov %s2155_s18  ;;  %s2696_s18 = smov %s2159_s19 }
 0x5fe   : > { %s2698_s20 = smov %s2257_s23  ;;  %25 = sbr.rel (!%p23_p1) target bundleno = 8 (0x8), region = 120 }
 0x602   : > { %s2697_s19 = smov %s2694_s21 }
 0x603   :  { %1523 = vsyncpa [#allocation3], 1 }
 0x604   :  { %1525 = vsyncpa [#allocation3 + $0x1], 1 }
 0x605   :  { %1526 = vsyncpa [#allocation6], 1 }
 0x606   :  { %1527 = vsyncpa [#allocation4], 1 }
 0x607   :  { %1529 = vsyncpa [#allocation4 + $0x1], 1 }

</bundles_post_ra>
